<compile_context>
chip_gen: v7x
topology: tpu7x:2x2x1
jax: 0.10.0
libtpu: 0.0.40
codegen_flags: <defaults>
</compile_context>

<pallas_src>
import jax
import jax.numpy as jnp
from jax.experimental import pallas as pl
from jax.experimental.pallas import tpu as pltpu


def _embed_kernel(ids_ref, t_hi_ref, t_lo_ref, out_ref):
    # ids_ref : (TILE_S,)           int32    flattened spatial ids for one (b, c)
    # t_hi_ref: (hidden, n_tokens)  bfloat16 high bf16 part of table.T
    # t_lo_ref: (hidden, n_tokens)  bfloat16 low  bf16 part of table.T
    # out_ref : (hidden, TILE_S)    float32  channel-major output tile
    tile_s = ids_ref.shape[0]
    n_tokens = t_hi_ref.shape[1]

    ids = ids_ref[...].reshape(1, tile_s)                                # (1, TILE_S)
    token_iota = jax.lax.broadcasted_iota(jnp.int32, (n_tokens, 1), 0)   # (n_tokens, 1)
    # Broadcast compare -> one-hot, built directly in bf16 (no full int32 iota).
    onehot = (token_iota == ids).astype(jnp.bfloat16)                    # (n_tokens, TILE_S)

    # Gather via MXU: (hidden, n_tokens) @ (n_tokens, TILE_S). Two bf16 passes
    # (hi + lo) accumulated in f32 recover ~f32 table precision.
    acc = jnp.dot(t_hi_ref[...], onehot, preferred_element_type=jnp.float32)
    acc = acc + jnp.dot(t_lo_ref[...], onehot, preferred_element_type=jnp.float32)
    out_ref[...] = acc.astype(out_ref.dtype)


def _choose_tile_s(s, max_tile=2048):
    """Largest spatial tile: full S if it fits, else a lane-aligned divisor."""
    if s <= max_tile:
        return s
    t = (max_tile // 128) * 128
    while t >= 128:
        if s % t == 0:
            return t
        t -= 128
    return max_tile  # no aligned divisor: caller pads the spatial axis


def pixel_embedding(x, table, *, max_tile_s=2048):
    """x: (B, C, H, W) integer token ids; table: (n_tokens, hidden) float32.

    Returns (B, C*hidden, H, W), matching the PyTorch module's forward.
    """
    B, C, H, W = x.shape
    n_tokens, hidden = table.shape
    S = H * W
    BC = B * C

    tile_s = _choose_tile_s(S, max_tile_s)
    n_s_tiles = pl.cdiv(S, tile_s)
    s_pad = n_s_tiles * tile_s

    ids = x.reshape(BC, S).astype(jnp.int32)
    if s_pad != S:
        # Tail tile: pad with id 0; padded columns are sliced off below.
        ids = jnp.pad(ids, ((0, 0), (0, s_pad - S)))
    ids = ids.reshape(BC, n_s_tiles, tile_s)

    # Pre-transposed table, split into two bf16 terms. hi = bf16(t) and
    # lo = t - hi (exact in f32), so hi + bf16(lo) is ~f32-accurate.
    t_t = table.T.astype(jnp.float32)                  # (hidden, n_tokens)
    t_hi = t_t.astype(jnp.bfloat16)
    t_lo = (t_t - t_hi.astype(jnp.float32)).astype(jnp.bfloat16)

    # NOTE: the two bf16 (hidden, n_tokens) table halves stay resident in VMEM
    # (constant index_map -> DMA'd once).  For very large tables (v7x: 64 MiB
    # VMEM) they would need tiling over n_tokens / single-buffering instead.
    out = pl.pallas_call(
        _embed_kernel,
        out_shape=jax.ShapeDtypeStruct((BC, hidden, s_pad), table.dtype),
        grid_spec=pltpu.PrefetchScalarGridSpec(
            num_scalar_prefetch=0,
            grid=(BC, n_s_tiles),
            in_specs=[
                # ids tile for one (b, c): squeezed to a 1-D (tile_s,) ref.
                pl.BlockSpec((None, None, tile_s), lambda bc, s: (bc, s, 0)),
                # full transposed table (hi / lo bf16 halves), resident.
                pl.BlockSpec((hidden, n_tokens), lambda bc, s: (0, 0)),
                pl.BlockSpec((hidden, n_tokens), lambda bc, s: (0, 0)),
            ],
            out_specs=pl.BlockSpec((None, hidden, tile_s), lambda bc, s: (bc, 0, s)),
        ),
        compiler_params=pltpu.CompilerParams(
            dimension_semantics=("parallel", "parallel"),
        ),
    )(ids, t_hi, t_lo)

    if s_pad != S:
        out = out[:, :, :S]

    # (B*C, hidden, H*W) row-major == (B, C, hidden, H, W) == (B, C*hidden, H, W):
    # metadata-only reshape (the permute was fused into the kernel).
    return out.reshape(B, C * hidden, H, W)


if __name__ == "__main__":
    # Small, deterministic example shapes consistent with the module.
    B, C, H, W = 2, 4, 16, 16
    n_tokens, hidden = 256, 32

    key = jax.random.PRNGKey(0)
    k_ids, k_tab = jax.random.split(key)

    x = jax.random.randint(k_ids, (B, C, H, W), 0, n_tokens, dtype=jnp.int32)
    # Deterministic "nn.Embedding"-style init (normal), synthetic weights.
    table = jax.random.normal(k_tab, (n_tokens, hidden), dtype=jnp.float32)

    out = pixel_embedding(x, table)
    out = jax.block_until_ready(out)

    # Reference check in plain JAX (same semantics as the PyTorch forward).
    emb_ref = jnp.take(table, x, axis=0)                        # (B, C, H, W, hidden)
    ref = jnp.transpose(emb_ref, (0, 1, 4, 2, 3)).reshape(B, C * hidden, H, W)

    assert out.shape == (B, C * hidden, H, W)
    # Two-term bf16 split gives <= ~2^-16 (~1.5e-5) worst-case relative error
    # vs. the exact f32 gather, so check with a matching tolerance.
    assert jnp.allclose(out, ref, atol=1e-5, rtol=5e-5), float(
        jnp.max(jnp.abs(out - ref))
    )
    print("KERNEL_OK")
</pallas_src>

<mosaic_0001>
module attributes {stable_mosaic.version = 11 : i64} {
  func.func @_embed_kernel(%arg0: i32, %arg1: i32, %arg2: memref<1x1x256xi32, #tpu.memory_space<vmem>>, %arg3: memref<32x256xbf16, #tpu.memory_space<vmem>>, %arg4: memref<32x256xbf16, #tpu.memory_space<vmem>>, %arg5: memref<1x32x256xf32, #tpu.memory_space<vmem>>) attributes {dimension_semantics = [#tpu.dimension_semantics<parallel>, #tpu.dimension_semantics<parallel>], iteration_bounds = array<i64: 8, 1>, scalar_prefetch = 0 : i64, scratch_operands = 0 : i64, tpu.core_type = #tpu.core_type<tc>, window_params = [{transform_indices = @transform_0, window_bounds = array<i64: 1, 1, 256>}, {pipeline_mode = #tpu.pipeline_mode<synchronous>, transform_indices = @transform_1, window_bounds = array<i64: 32, 256>}, {pipeline_mode = #tpu.pipeline_mode<synchronous>, transform_indices = @transform_2, window_bounds = array<i64: 32, 256>}, {transform_indices = @transform_3, window_bounds = array<i64: 1, 32, 256>}]} {
    %c0 = arith.constant 0 : index
    %c0_0 = arith.constant 0 : index
    %c0_1 = arith.constant 0 : index
    %0 = vector.load %arg2[%c0, %c0_0, %c0_1] : memref<1x1x256xi32, #tpu.memory_space<vmem>>, vector<1x1x256xi32>
    %1 = vector.shape_cast %0 : vector<1x1x256xi32> to vector<256xi32>
    %2 = vector.shape_cast %1 : vector<256xi32> to vector<1x256xi32>
    %3 = tpu.iota {dimensions = array<i32: 0>} : vector<256x1xi32>
    %4 = vector.broadcast %3 : vector<256x1xi32> to vector<256x256xi32>
    %5 = vector.broadcast %2 : vector<1x256xi32> to vector<256x256xi32>
    %6 = arith.cmpi eq, %4, %5 : vector<256x256xi32>
    %7 = arith.extui %6 : vector<256x256xi1> to vector<256x256xi32>
    %8 = arith.sitofp %7 : vector<256x256xi32> to vector<256x256xf32>
    %9 = arith.truncf %8 : vector<256x256xf32> to vector<256x256xbf16>
    %c0_2 = arith.constant 0 : index
    %c0_3 = arith.constant 0 : index
    %10 = vector.load %arg3[%c0_2, %c0_3] : memref<32x256xbf16, #tpu.memory_space<vmem>>, vector<32x256xbf16>
    %cst = arith.constant dense<0.000000e+00> : vector<32x256xf32>
    %11 = tpu.matmul %10, %9, %cst {dimension_numbers = #tpu.dot_dimension_numbers<[1], [0], [0], [1], [0, 0, 1, 1], [], []>} : vector<32x256xbf16>, vector<256x256xbf16>, vector<32x256xf32> -> vector<32x256xf32>
    %c0_4 = arith.constant 0 : index
    %c0_5 = arith.constant 0 : index
    %12 = vector.load %arg4[%c0_4, %c0_5] : memref<32x256xbf16, #tpu.memory_space<vmem>>, vector<32x256xbf16>
    %cst_6 = arith.constant dense<0.000000e+00> : vector<32x256xf32>
    %13 = tpu.matmul %12, %9, %cst_6 {dimension_numbers = #tpu.dot_dimension_numbers<[1], [0], [0], [1], [0, 0, 1, 1], [], []>} : vector<32x256xbf16>, vector<256x256xbf16>, vector<32x256xf32> -> vector<32x256xf32>
    %14 = arith.addf %11, %13 : vector<32x256xf32>
    %c0_7 = arith.constant 0 : index
    %c0_8 = arith.constant 0 : index
    %c0_9 = arith.constant 0 : index
    %15 = vector.load %arg5[%c0_7, %c0_8, %c0_9] : memref<1x32x256xf32, #tpu.memory_space<vmem>>, vector<1x32x256xf32>
    %16 = vector.shape_cast %15 : vector<1x32x256xf32> to vector<32x256xf32>
    %17 = vector.shape_cast %14 : vector<32x256xf32> to vector<1x32x256xf32>
    tpu.vector_store %arg5[%c0_7, %c0_8, %c0_9], %17 {strides = array<i32>} : memref<1x32x256xf32, #tpu.memory_space<vmem>>, vector<1x32x256xf32>,
    return
  }
  func.func @transform_0(%arg0: i32, %arg1: i32) -> (i32, i32, i32) {
    %c0_i32 = arith.constant 0 : i32
    %c0_i32_0 = arith.constant 0 : i32
    return %arg0, %arg1, %c0_i32 : i32, i32, i32
  }
  func.func @transform_1(%arg0: i32, %arg1: i32) -> (i32, i32) {
    %c0_i32 = arith.constant 0 : i32
    %c0_i32_0 = arith.constant 0 : i32
    %c0_i32_1 = arith.constant 0 : i32
    return %c0_i32, %c0_i32_0 : i32, i32
  }
  func.func @transform_2(%arg0: i32, %arg1: i32) -> (i32, i32) {
    %c0_i32 = arith.constant 0 : i32
    %c0_i32_0 = arith.constant 0 : i32
    %c0_i32_1 = arith.constant 0 : i32
    return %c0_i32, %c0_i32_0 : i32, i32
  }
  func.func @transform_3(%arg0: i32, %arg1: i32) -> (i32, i32, i32) {
    %c0_i32 = arith.constant 0 : i32
    %c0_i32_0 = arith.constant 0 : i32
    return %arg0, %c0_i32, %arg1 : i32, i32, i32
  }
}

</mosaic_0001>

<bundles_post_ra>
// kernel: tpu_custom_call.1
= control target key start
LH: loop header
LB: loop body
LE: loop exit
PB: predicated region body
PF: predicated region fallthrough
CT: control target
= control target key end

     0   :  { %8 = vsyncpa [#allocation3], 0  ;;  %s1738_s0 = inlined_call_operand.hbm [shape: s32[8,1,256], index: 0, kind: input, shape index: {}]   ;;  %s1739_s1 = inlined_call_operand.hbm [shape: bf16[32,256], index: 1, kind: input, shape index: {}]   ;;  %s1740_s2 = inlined_call_operand.hbm [shape: bf16[32,256], index: 2, kind: input, shape index: {}]   ;;  %s1741_s3 = inlined_call_operand.hbm [shape: f32[8,32,256], index: 3, kind: output, shape index: {}]  }
   0x1   :  { %10 = vsyncpa [#allocation3 + $0x1], 0 }
   0x2   :  { %11 = vsyncpa [#allocation6], 0 }
   0x3   :  { %12 = vsyncpa [#allocation4], 0 }
   0x4   :  { %14 = vsyncpa [#allocation4 + $0x1], 0  ;;  %s1317_s12 = smov 0   ;;  %s1319_s13 = smov 0  }
   0x5   :  { %s1321_s14 = smov 0   ;;  %s1323_s15 = smov 0  }
   0x6   :  { %s1325_s16 = smov 0   ;;  %s1327_s17 = smov 0  }
   0x7 LB: > { %s785_s18 = sadd.s32 4294967295, %s1286_s17   ;;  %s786_s19 = sadd.s32 4294967294, %s1286_s17   ;;  %s1286_s17 = sphi %s1327_s17, %s20_s17   ;;  %s1282_s16 = sphi %s1325_s16, %s1763_s16   ;;  %s1278_s15 = sphi %s1323_s15, %s1762_s15   ;;  %s1274_s14 = sphi %s1321_s14, %s1761_s14   ;;  %s1270_s13 = sphi %s1319_s13, %s1760_s13   ;;  %s1266_s12 = sphi %s1317_s12, %s1759_s12  }
   0x8   : > { %p54_p0 = scmp.ne.s32.totalorder %s1270_s13, %s1266_s12  ;;  %p1351_p1 = scmp.eq.s32.totalorder %s785_s18, 0 }
   0x9   : > { %p1355_p2 = scmp.eq.s32.totalorder %s785_s18, 7  ;;  %p128_p3 = scmp.eq.s32.totalorder %s786_s19, 7 }
   0xa   : > { %s1746_s20 = scalar_select %p1351_p1, 1, 0 }
   0xb   : > { %s1747_s21 = scalar_select %p1355_p2, 1, 0 }
   0xc   : > { %p1361_p4 = por %p1351_p1, %p54_p0  ;;  %p787_p5 = scmp.ge.s32.totalorder %s1286_s17, 1 }
   0xd   : > { %p1366_p6 = por %p128_p3, %p54_p0  ;;  %p135_p7 = scmp.lt.s32.totalorder %s1286_s17, 9 }
   0xe   : > { %s1748_s22 = scalar_select %p1361_p4, 1, 0 }
   0xf   : > { %s1749_s23 = scalar_select %p1366_p6, 1, 0 }
  0x10   : > { %p1371_p8 = pnand %p787_p5, %p135_p7  ;;  %s1288_s25 = smov [#allocation5]  }
  0x11   : > { %s147_s26 = sshll.u32 %s1288_s25, 4  ;;  %s1289_s28 = smov [#allocation7]   ;;  %s148_s26 = int_to_ptr.vmem [resolvable:$true] %s147_s26 }
  0x12   : > { %s1750_s24 = scalar_select %p1371_p8, 1, 0 }
  0x13   : > { %p1026_p9 = pneg %p1371_p8  ;;  %s160_s29 = sshll.u32 %s1289_s28, 4  ;;  %s1383_s29 = int_to_ptr.vmem [resolvable:$true] %s160_s29 }
  0x14   : > { %s1114_s5 = scalar_lea.hbm %s1739_s1, 512 }
  0x15   : > { %p1379_p10 = pnand %p1026_p9, %p1351_p1  ;;  %p1115_p11 = scmp.ne.s32.totalorder %s1739_s1, %s1114_s5 }
  0x16   : > { %p1121_p3 = scmp.lt.u32.totalorder %s1114_s5, %s1739_s1 }
  0x17   : > { %p1116_p12 = pneg %p1379_p10 }
  0x19   : > { %p1117_p13 = pnand %p1116_p12, %p1115_p11 }
  0x1b   : > { %p1118_p0 = pneg %p1117_p13 }
  0x1d   : > { %p1123_p5 = pnand %p1121_p3, %p1118_p0 }
  0x1f   : > { %1126 = shalt.err (!%p1123_p5)
}
  0x20   : > { %s1127_s10 = scalar_lea.vmem %s148_s26, 512  ;;  %p1135_p1 = scmp.lt.s32.totalorder %s148_s26, %s148_s26 }
  0x21   : > { %p1128_p7 = scmp.ne.s32.totalorder %s148_s26, %s1127_s10  ;;  %p1136_p4 = scmp.lt.s32.totalorder %s1127_s10, %s1127_s10 }
  0x23   : > { %p1130_p9 = pnand %p1128_p7, %p1116_p12  ;;  %p1137_p8 = por %p1136_p4, %p1135_p1 }
  0x25   : > { %p1131_p6 = pneg %p1130_p9 }
  0x27   : > { %p1138_p2 = pnand %p1137_p8, %p1131_p6 }
  0x29   : > { %1141 = shalt.err (!%p1138_p2)
}
  0x2a   : > { %s1290_s11 = smov 128   ;;  %s1291_s18 = smov 8  }
  0x2b   : > { %1029 = dma.hbm_to_vmem [thread:$0]  (!%p1379_p10), %s1739_s1, 512, %s148_s26, [#allocation6], %s1290_s11, %s1290_s11, %s1291_s18  }
  0x2c   : > { %s1142_s4 = scalar_lea.hbm %s1740_s2, 512 }
  0x2d   : > { %p1143_p11 = scmp.ne.s32.totalorder %s1740_s2, %s1142_s4  ;;  %p1149_p4 = scmp.lt.u32.totalorder %s1142_s4, %s1740_s2 }
  0x2f   : > { %p1145_p1 = pnand %p1143_p11, %p1116_p12 }
  0x31   : > { %p1146_p2 = pneg %p1145_p1 }
  0x33   : > { %p1151_p6 = pnand %p1149_p4, %p1146_p2 }
  0x35   : > { %1154 = shalt.err (!%p1151_p6)
}
  0x36   : > { %s1155_s26 = scalar_lea.vmem %s1383_s29, 512  ;;  %p1163_p3 = scmp.lt.s32.totalorder %s1383_s29, %s1383_s29 }
  0x37   : > { %p1156_p8 = scmp.ne.s32.totalorder %s1383_s29, %s1155_s26  ;;  %p1164_p5 = scmp.lt.s32.totalorder %s1155_s26, %s1155_s26 }
  0x39   : > { %p1158_p13 = pnand %p1156_p8, %p1116_p12  ;;  %p1165_p7 = por %p1164_p5, %p1163_p3 }
  0x3b   : > { %p1159_p0 = pneg %p1158_p13 }
  0x3d   : > { %p1166_p9 = pnand %p1165_p7, %p1159_p0 }
  0x3f   : > { %1169 = shalt.err (!%p1166_p9)
}
  0x40   : > { %1032 = dma.hbm_to_vmem [thread:$0]  (!%p1379_p10), %s1740_s2, 512, %s1383_s29, [#allocation6], %s1290_s11, %s1290_s11, %s1291_s18  }
  0x41   : > { %s32_s19 = sadd.s32 1, %s1282_s16  ;;  %s41_s25 = sadd.s32 1, %s1274_s14 }
  0x42   : > { %p34_p12 = scmp.ge.s32.totalorder %s32_s19, 8  ;;  %p48_p11 = scmp.ne.s32.totalorder %s1274_s14, %s1270_s13 }
  0x43   : > { %p49_p1 = scmp.eq.s32.totalorder %s1286_s17, 0  ;;  %p1043_p2 = scmp.lt.s32.totalorder %s1286_s17, 8 }
  0x44   : > { %s1765_s19 = smov (%p34_p12, %s32_s19), 0  ;;  %p1752_p6 = scmp.ne.s32.totalorder %s1747_s21, 0 }
  0x45   : > { %p50_p4 = por %p49_p1, %p48_p11  ;;  %s36_s28 = ssub.s32 %s1282_s16, %s1765_s19 }
  0x46   : > { %p1442_p8 = por %p1752_p6, %p48_p11  ;;  %s174_s30 = sand.u32 1, %s1274_s14  }
  0x47   : > { %p39_p13 = scmp.eq.s32.totalorder %s36_s28, 0  ;;  %s791_s29 = sshll.u32 %s174_s30, 1 }
  0x48   : > { %s1004_s11 = sshll.u32 %s1282_s16, 5  ;;  %s178_s21 = scalar_lea.vmem [#allocation2], %s791_s29 }
  0x49   : > { %s1451_s18 = scalar_select %p39_p13, %s1274_s14, %s41_s25  }
  0x4a   : > { %s1456_s6 = scalar_lea.hbm %s1738_s0, %s1004_s11  ;;  %s188_s7 = sshll.u32 %s178_s21, 4  ;;  %s1464_s7 = int_to_ptr.vmem [resolvable:$true] %s188_s7 }
  0x4b   : > { %p1460_p10 = pnand %p1043_p2, %p50_p4  ;;  %s175_s26 = scalar_lea.sflag [#allocation3], %s174_s30 }
  0x4c   : > { %s1170_s9 = scalar_lea.hbm %s1456_s6, 32  ;;  %s1175_s28 = scalar_lea.hbm %s1738_s0, 256 }
  0x4d   : > { %p1171_p0 = scmp.ne.s32.totalorder %s1456_s6, %s1170_s9  ;;  %p1172_p3 = pneg %p1460_p10 }
  0x4e   : > { %p1176_p9 = scmp.lt.u32.totalorder %s1456_s6, %s1738_s0  ;;  %p1177_p12 = scmp.lt.u32.totalorder %s1175_s28, %s1170_s9 }
  0x4f   : > { %p1173_p5 = pnand %p1172_p3, %p1171_p0  ;;  %p1179_p1 = scmp.lt.u32.totalorder %s1170_s9, %s1456_s6 }
  0x50   : > { %p1178_p11 = por %p1177_p12, %p1176_p9 }
  0x51   : > { %p1174_p7 = pneg %p1173_p5 }
  0x52   : > { %p1180_p2 = por %p1179_p1, %p1178_p11 }
  0x54   : > { %p1181_p4 = pnand %p1180_p2, %p1174_p7 }
  0x56   : > { %1184 = shalt.err (!%p1181_p4)
}
  0x57   : > { %s1185_s30 = scalar_lea.vmem %s1464_s7, 32  ;;  %s1292_s4 = smov [#allocation2]  }
  0x58   : > { %p1186_p6 = scmp.ne.s32.totalorder %s1464_s7, %s1185_s30  ;;  %s1190_s5 = sshll.u32 %s1292_s4, 4  ;;  %s1191_s5 = int_to_ptr.vmem [resolvable:$false] %s1190_s5 }
  0x59   : > { %s1192_s21 = scalar_lea.vmem %s1191_s5, 64  ;;  %p1193_p5 = scmp.lt.s32.totalorder %s1464_s7, %s1191_s5 }
  0x5a   : > { %p1188_p13 = pnand %p1186_p6, %p1172_p3  ;;  %p1194_p9 = scmp.lt.s32.totalorder %s1192_s21, %s1185_s30 }
  0x5c   : > { %p1189_p0 = pneg %p1188_p13  ;;  %p1195_p12 = por %p1194_p9, %p1193_p5 }
  0x5e   : > { %p1196_p11 = pnand %p1195_p12, %p1189_p0 }
  0x60   : > { %1199 = shalt.err (!%p1196_p11)
}
  0x61   : > { %1036 = dma.hbm_to_vmem [thread:$0]  (!%p1460_p10), %s1456_s6, 32, %s1464_s7, %s175_s26  }
  0x62   : > { %p1755_p7 = scmp.ne.s32.totalorder %s1750_s24, 0 }
  0x63   : > { %s1494_s9 = sand.u32 (!%p1755_p7), 1, %s1270_s13   ;;  %p1756_p3 = scmp.ne.s32.totalorder (!%p1755_p7), %s1748_s22, 0 }
  0x64   : > { %197 = sbr.rel (%p1755_p7) target bundleno = 425 (0x1a9), region = 32  ;;  %s795_s10 = sshll.u32 (!%p1755_p7), %s1494_s9, 1 }
  0x65   : > { %s200_s25 = scalar_lea.sflag (!%p1755_p7), [#allocation3], %s1494_s9  ;;  %s203_s28 = scalar_lea.vmem (!%p1755_p7), [#allocation2], %s795_s10 }
  0x6b   : > { %1253 = dma.done.wait (%p1756_p3), %s200_s25, 32  }
  0x6c   : > { %1255 = vsyncadd (%p1756_p3), %s200_s25, 4294967264  ;;  %p1757_p1 = scmp.ne.s32.totalorder %s1746_s20, 0 }
  0x6e   : > { %1257 = dma.done.wait (%p1757_p1), [#allocation6], 1024  }
  0x6f   : > { %1259 = vsyncadd (%p1757_p1), [#allocation6], 4294966272  ;;  %v236_v0 = vlaneseq  ;;  %v235_v5 = vld [vmem:[%s203_s28] sm:$0x3]  ;;  %v1104_v12 = vld [vmem:[#allocation7 + $0x4] ss:$8 sps:$4 sm:$0xff]  }
  0x70   : > { %561 = vmatprep.mubr.bf16.mxu1 %v1104_v12  ;;  %v1107_v13 = vld [vmem:[#allocation5 + $0x4] ss:$8 sps:$4 sm:$0xff]   ;;  %v1293_v14 = vmov 1.0|1.0   ;;  %v1102_v41 = vld [vmem:[#allocation7] ss:$8 sps:$4 sm:$0xff]  }
  0x71   : > { %v1506_v1 = vshrl.u32 %v236_v0, 7  ;;  %634 = vmatprep.mubr.bf16.mxu0 %v1107_v13  ;;  %v1105_v42 = vld [vmem:[#allocation5] ss:$8 sps:$4 sm:$0xff]   ;;  %v1108_v43 = vld [vmem:[#allocation7 + $0x14] ss:$8 sps:$4 sm:$0xff]   ;;  %s798_s20 = sshll.u32 %s1494_s9, 6 }
  0x72   : > { %v1110_v44 = vld [vmem:[#allocation5 + $0x14] ss:$8 sps:$4 sm:$0xff]   ;;  %v1112_v45 = vld [vmem:[#allocation7 + $0x10] ss:$8 sps:$4 sm:$0xff]   ;;  %s233_s22 = scalar_lea.vmem [#allocation8], %s798_s20  ;;  %s1005_s6 = sshll.u32 %s1278_s15, 10 }
  0x73   : > { %v275_v2 = vsub.s32 1, %v1506_v1  ;;  %v271_v3 = vsub.s32 0, %v1506_v1  ;;  %v238_v4 = vadd.s32 8, %v1506_v1  ;;  %v239_v6 = vadd.s32 16, %v1506_v1  ;;  %v1113_v46 = vld [vmem:[#allocation5 + $0x10] ss:$8 sps:$4 sm:$0xff]   ;;  %s1690_s15 = scalar_lea.hbm %s1741_s3, %s1005_s6 }
  0x74   : > { %v240_v7 = vadd.s32 24, %v1506_v1  ;;  %v241_v10 = vadd.s32 32, %v1506_v1  ;;  %v242_v11 = vadd.s32 40, %v1506_v1  ;;  %v243_v15 = vadd.s32 48, %v1506_v1  ;;  %s679_s24 = sshll.u32 %s233_s22, 4  ;;  %s664_s26 = scalar_lea.sflag [#allocation4], %s1494_s9  ;;  %s1685_s24 = int_to_ptr.vmem [resolvable:$true] %s679_s24 }
  0x75   : > { %v1513_v8 = vrot.slane %v235_v5, %v275_v2  ;;  %v1515_v9 = vrot.slane %v235_v5, %v271_v3  ;;  %v244_v16 = vadd.s32 56, %v1506_v1  ;;  %v245_v17 = vadd.s32 64, %v1506_v1  ;;  %s1200_s29 = scalar_lea.vmem %s1685_s24, 1024  ;;  %s1294_s11 = smov [#allocation8]  }
  0x76   : > { %v246_v18 = vadd.s32 72, %v1506_v1  ;;  %v247_v19 = vadd.s32 80, %v1506_v1  ;;  %v248_v20 = vadd.s32 88, %v1506_v1  ;;  %v249_v21 = vadd.s32 96, %v1506_v1  ;;  %p1201_p10 = scmp.ne.s32.totalorder %s1685_s24, %s1200_s29  ;;  %s1204_s30 = sshll.u32 %s1294_s11, 4  ;;  %s1205_s30 = int_to_ptr.vmem [resolvable:$false] %s1204_s30 }
  0x77   : > { %vm278_vm0 = vcmp.eq.s32.totalorder %v1506_v1, %v1513_v8  ;;  %vm280_vm1 = vcmp.eq.s32.totalorder %v238_v4, %v1513_v8  ;;  %vm277_vm2 = vcmp.eq.s32.totalorder %v1506_v1, %v1515_v9  ;;  %vm279_vm3 = vcmp.eq.s32.totalorder %v238_v4, %v1515_v9  ;;  %s1206_s4 = scalar_lea.vmem %s1205_s30, 2048  ;;  %p1207_p6 = scmp.lt.s32.totalorder %s1685_s24, %s1205_s30 }
  0x78   : > { %vm867_vm4 = vmpackc.low %vm280_vm1, %vm278_vm0  ;;  %vm282_vm5 = vcmp.eq.s32.totalorder %v239_v6, %v1513_v8  ;;  %vm284_vm6 = vcmp.eq.s32.totalorder %v240_v7, %v1513_v8  ;;  %vm281_vm7 = vcmp.eq.s32.totalorder %v239_v6, %v1515_v9  ;;  %vm283_vm8 = vcmp.eq.s32.totalorder %v240_v7, %v1515_v9  ;;  %p1202_p2 = pnand %p1201_p10, %p1442_p8  ;;  %p1208_p13 = scmp.lt.s32.totalorder %s1206_s4, %s1200_s29 }
  0x79   : > { %868 = vmatprep.subr.msk.bf16.mxu1 %vm867_vm4, %v1293_v14  ;;  %936 = vmatprep.subr.msk.bf16.mxu0 %vm867_vm4, %v1293_v14  ;;  %vm869_vm9 = vmpackc.low %vm279_vm3, %vm277_vm2  ;;  %vm286_vm10 = vcmp.eq.s32.totalorder %v241_v10, %v1513_v8  ;;  %vm288_vm11 = vcmp.eq.s32.totalorder %v242_v11, %v1513_v8  ;;  %vm285_vm15 = vcmp.eq.s32.totalorder %v241_v10, %v1515_v9  ;;  %v250_v22 = vadd.s32 104, %v1506_v1 }
  0x7a   : > { %870 = vmatpush1.bf16.msk.msra.mxu1 %vm869_vm9, %v1293_v14  ;;  %938 = vmatpush1.bf16.msk.msra.mxu0 %vm869_vm9, %v1293_v14  ;;  %vm871_vm12 = vmpackc.low %vm284_vm6, %vm282_vm5  ;;  %vm287_vm0 = vcmp.eq.s32.totalorder %v242_v11, %v1515_v9  ;;  %vm290_vm1 = vcmp.eq.s32.totalorder %v243_v15, %v1513_v8  ;;  %vm292_vm2 = vcmp.eq.s32.totalorder %v244_v16, %v1513_v8  ;;  %v251_v23 = vadd.s32 112, %v1506_v1  ;;  %p1203_p4 = pneg %p1202_p2  ;;  %p1209_p0 = por %p1208_p13, %p1207_p6 }
  0x7b   : > { %872 = vmatprep.subr.msk.bf16.mxu1 %vm871_vm12, %v1293_v14  ;;  %940 = vmatprep.subr.msk.bf16.mxu0 %vm871_vm12, %v1293_v14  ;;  %vm873_vm13 = vmpackc.low %vm283_vm8, %vm281_vm7  ;;  %vm289_vm5 = vcmp.eq.s32.totalorder %v243_v15, %v1515_v9  ;;  %vm291_vm6 = vcmp.eq.s32.totalorder %v244_v16, %v1515_v9  ;;  %vm294_vm7 = vcmp.eq.s32.totalorder %v245_v17, %v1513_v8  ;;  %v252_v24 = vadd.s32 120, %v1506_v1 }
  0x7c   : > { %vm875_vm14 = vmpackc.low %vm288_vm11, %vm286_vm10  ;;  %vm296_vm8 = vcmp.eq.s32.totalorder %v246_v18, %v1513_v8  ;;  %vm293_vm11 = vcmp.eq.s32.totalorder %v245_v17, %v1515_v9  ;;  %vm295_vm12 = vcmp.eq.s32.totalorder %v246_v18, %v1515_v9  ;;  %v253_v25 = vadd.s32 128, %v1506_v1  ;;  %p1210_p5 = pnand %p1209_p0, %p1203_p4 }
  0x7d   : > { %vm877_vm3 = vmpackc.low %vm287_vm0, %vm285_vm15  ;;  %v254_v26 = vadd.s32 136, %v1506_v1  ;;  %v255_v27 = vadd.s32 144, %v1506_v1  ;;  %v256_v28 = vadd.s32 152, %v1506_v1  ;;  %v257_v29 = vadd.s32 160, %v1506_v1 }
  0x7e   : > { %874 = vmatpush1.bf16.msk.msra.mxu1 %vm873_vm13, %v1293_v14  ;;  %942 = vmatpush1.bf16.msk.msra.mxu0 %vm873_vm13, %v1293_v14  ;;  %vm879_vm4 = vmpackc.low %vm292_vm2, %vm290_vm1  ;;  %vm298_vm13 = vcmp.eq.s32.totalorder %v247_v19, %v1513_v8  ;;  %vm297_vm1 = vcmp.eq.s32.totalorder %v247_v19, %v1515_v9  ;;  %vm299_vm2 = vcmp.eq.s32.totalorder %v248_v20, %v1515_v9  ;;  %v258_v30 = vadd.s32 168, %v1506_v1 }
  0x7f   : > { %876 = vmatprep.subr.msk.bf16.mxu1 %vm875_vm14, %v1293_v14  ;;  %944 = vmatprep.subr.msk.bf16.mxu0 %vm875_vm14, %v1293_v14  ;;  %vm881_vm9 = vmpackc.low %vm291_vm6, %vm289_vm5  ;;  %vm300_vm14 = vcmp.eq.s32.totalorder %v248_v20, %v1513_v8  ;;  %v259_v31 = vadd.s32 176, %v1506_v1  ;;  %v260_v32 = vadd.s32 184, %v1506_v1  ;;  %v261_v33 = vadd.s32 192, %v1506_v1 }
  0x80   : > { %vm883_vm10 = vmpackc.low %vm296_vm8, %vm294_vm7  ;;  %vm301_vm7 = vcmp.eq.s32.totalorder %v249_v21, %v1515_v9  ;;  %vm303_vm8 = vcmp.eq.s32.totalorder %v250_v22, %v1515_v9  ;;  %v262_v34 = vadd.s32 200, %v1506_v1  ;;  %v263_v35 = vadd.s32 208, %v1506_v1 }
  0x81   : > { %vm885_vm15 = vmpackc.low %vm295_vm12, %vm293_vm11  ;;  %v264_v36 = vadd.s32 216, %v1506_v1  ;;  %v265_v37 = vadd.s32 224, %v1506_v1  ;;  %v266_v38 = vadd.s32 232, %v1506_v1  ;;  %v267_v39 = vadd.s32 240, %v1506_v1 }
  0x82   : > { %878 = vmatpush1.bf16.msk.msra.mxu1 %vm877_vm3, %v1293_v14  ;;  %946 = vmatpush1.bf16.msk.msra.mxu0 %vm877_vm3, %v1293_v14  ;;  %vm887_vm0 = vmpackc.low %vm300_vm14, %vm298_vm13  ;;  %vm302_vm3 = vcmp.eq.s32.totalorder %v249_v21, %v1513_v8  ;;  %vm305_vm13 = vcmp.eq.s32.totalorder %v251_v23, %v1515_v9  ;;  %vm307_vm14 = vcmp.eq.s32.totalorder %v252_v24, %v1515_v9  ;;  %v268_v40 = vadd.s32 248, %v1506_v1 }
  0x83   : > { %880 = vmatprep.subr.msk.bf16.mxu1 %vm879_vm4, %v1293_v14  ;;  %948 = vmatprep.subr.msk.bf16.mxu0 %vm879_vm4, %v1293_v14  ;;  %vm304_vm4 = vcmp.eq.s32.totalorder %v250_v22, %v1513_v8  ;;  %vm889_vm5 = vmpackc.low %vm299_vm2, %vm297_vm1 }
  0x84   : > { %vm891_vm6 = vmpackc.low %vm304_vm4, %vm302_vm3  ;;  %vm309_vm3 = vcmp.eq.s32.totalorder %v253_v25, %v1515_v9  ;;  %vm311_vm4 = vcmp.eq.s32.totalorder %v254_v26, %v1515_v9 }
  0x85   : > { %vm893_vm11 = vmpackc.low %vm303_vm8, %vm301_vm7 }
  0x86   : > { %882 = vmatpush1.bf16.msk.msra.mxu1 %vm881_vm9, %v1293_v14  ;;  %950 = vmatpush1.bf16.msk.msra.mxu0 %vm881_vm9, %v1293_v14  ;;  %vm306_vm9 = vcmp.eq.s32.totalorder %v251_v23, %v1513_v8  ;;  %vm897_vm1 = vmpackc.low %vm307_vm14, %vm305_vm13 }
  0x87   : > { %884 = vmatprep.subr.msk.bf16.mxu1 %vm883_vm10, %v1293_v14  ;;  %952 = vmatprep.subr.msk.bf16.mxu0 %vm883_vm10, %v1293_v14  ;;  %vm308_vm10 = vcmp.eq.s32.totalorder %v252_v24, %v1513_v8  ;;  %vm901_vm7 = vmpackc.low %vm311_vm4, %vm309_vm3 }
  0x88   : > { %vm895_vm12 = vmpackc.low %vm308_vm10, %vm306_vm9  ;;  %vm313_vm9 = vcmp.eq.s32.totalorder %v255_v27, %v1515_v9  ;;  %vm315_vm10 = vcmp.eq.s32.totalorder %v256_v28, %v1515_v9 }
  0x89   : > { %vm905_vm13 = vmpackc.low %vm315_vm10, %vm313_vm9 }
  0x8a   : > { %886 = vmatpush1.bf16.msk.msra.mxu1 %vm885_vm15, %v1293_v14  ;;  %954 = vmatpush1.bf16.msk.msra.mxu0 %vm885_vm15, %v1293_v14  ;;  %vm310_vm15 = vcmp.eq.s32.totalorder %v253_v25, %v1513_v8 }
  0x8b   : > { %888 = vmatprep.subr.msk.bf16.mxu1 %vm887_vm0, %v1293_v14  ;;  %956 = vmatprep.subr.msk.bf16.mxu0 %vm887_vm0, %v1293_v14  ;;  %vm312_vm0 = vcmp.eq.s32.totalorder %v254_v26, %v1513_v8 }
  0x8c   : > { %vm899_vm2 = vmpackc.low %vm312_vm0, %vm310_vm15  ;;  %vm317_vm15 = vcmp.eq.s32.totalorder %v257_v29, %v1515_v9  ;;  %vm319_vm0 = vcmp.eq.s32.totalorder %v258_v30, %v1515_v9 }
  0x8d   : > { %vm909_vm3 = vmpackc.low %vm319_vm0, %vm317_vm15 }
  0x8e   : > { %890 = vmatpush1.bf16.msk.msra.mxu1 %vm889_vm5, %v1293_v14  ;;  %958 = vmatpush1.bf16.msk.msra.mxu0 %vm889_vm5, %v1293_v14  ;;  %vm314_vm5 = vcmp.eq.s32.totalorder %v255_v27, %v1513_v8 }
  0x8f   : > { %892 = vmatprep.subr.msk.bf16.mxu1 %vm891_vm6, %v1293_v14  ;;  %960 = vmatprep.subr.msk.bf16.mxu0 %vm891_vm6, %v1293_v14  ;;  %vm316_vm6 = vcmp.eq.s32.totalorder %v256_v28, %v1513_v8 }
  0x90   : > { %vm903_vm8 = vmpackc.low %vm316_vm6, %vm314_vm5  ;;  %vm321_vm5 = vcmp.eq.s32.totalorder %v259_v31, %v1515_v9  ;;  %vm323_vm6 = vcmp.eq.s32.totalorder %v260_v32, %v1515_v9 }
  0x91   : > { %vm913_vm9 = vmpackc.low %vm323_vm6, %vm321_vm5 }
  0x92   : > { %894 = vmatpush1.bf16.msk.msra.mxu1 %vm893_vm11, %v1293_v14  ;;  %962 = vmatpush1.bf16.msk.msra.mxu0 %vm893_vm11, %v1293_v14  ;;  %vm318_vm11 = vcmp.eq.s32.totalorder %v257_v29, %v1513_v8 }
  0x93   : > { %896 = vmatprep.subr.msk.bf16.mxu1 %vm895_vm12, %v1293_v14  ;;  %964 = vmatprep.subr.msk.bf16.mxu0 %vm895_vm12, %v1293_v14  ;;  %vm320_vm12 = vcmp.eq.s32.totalorder %v258_v30, %v1513_v8 }
  0x94   : > { %vm907_vm14 = vmpackc.low %vm320_vm12, %vm318_vm11  ;;  %vm325_vm11 = vcmp.eq.s32.totalorder %v261_v33, %v1515_v9  ;;  %vm327_vm12 = vcmp.eq.s32.totalorder %v262_v34, %v1515_v9 }
  0x95   : > { %vm917_vm15 = vmpackc.low %vm327_vm12, %vm325_vm11 }
  0x96   : > { %898 = vmatpush1.bf16.msk.msra.mxu1 %vm897_vm1, %v1293_v14  ;;  %966 = vmatpush1.bf16.msk.msra.mxu0 %vm897_vm1, %v1293_v14  ;;  %vm322_vm1 = vcmp.eq.s32.totalorder %v259_v31, %v1513_v8 }
  0x97   : > { %900 = vmatprep.subr.msk.bf16.mxu1 %vm899_vm2, %v1293_v14  ;;  %968 = vmatprep.subr.msk.bf16.mxu0 %vm899_vm2, %v1293_v14  ;;  %vm324_vm2 = vcmp.eq.s32.totalorder %v260_v32, %v1513_v8 }
  0x98   : > { %vm911_vm4 = vmpackc.low %vm324_vm2, %vm322_vm1  ;;  %vm329_vm1 = vcmp.eq.s32.totalorder %v263_v35, %v1515_v9  ;;  %vm331_vm2 = vcmp.eq.s32.totalorder %v264_v36, %v1515_v9 }
  0x99   : > { %vm921_vm5 = vmpackc.low %vm331_vm2, %vm329_vm1 }
  0x9a   : > { %902 = vmatpush1.bf16.msk.msra.mxu1 %vm901_vm7, %v1293_v14  ;;  %970 = vmatpush1.bf16.msk.msra.mxu0 %vm901_vm7, %v1293_v14  ;;  %vm326_vm7 = vcmp.eq.s32.totalorder %v261_v33, %v1513_v8 }
  0x9b   : > { %904 = vmatprep.subr.msk.bf16.mxu1 %vm903_vm8, %v1293_v14  ;;  %972 = vmatprep.subr.msk.bf16.mxu0 %vm903_vm8, %v1293_v14  ;;  %vm328_vm8 = vcmp.eq.s32.totalorder %v262_v34, %v1513_v8 }
  0x9c   : > { %vm915_vm10 = vmpackc.low %vm328_vm8, %vm326_vm7  ;;  %vm333_vm7 = vcmp.eq.s32.totalorder %v265_v37, %v1515_v9  ;;  %vm335_vm8 = vcmp.eq.s32.totalorder %v266_v38, %v1515_v9 }
  0x9d   : > { %vm925_vm11 = vmpackc.low %vm335_vm8, %vm333_vm7 }
  0x9e   : > { %906 = vmatpush1.bf16.msk.msra.mxu1 %vm905_vm13, %v1293_v14  ;;  %974 = vmatpush1.bf16.msk.msra.mxu0 %vm905_vm13, %v1293_v14  ;;  %vm330_vm13 = vcmp.eq.s32.totalorder %v263_v35, %v1513_v8 }
  0x9f   : > { %908 = vmatprep.subr.msk.bf16.mxu1 %vm907_vm14, %v1293_v14  ;;  %976 = vmatprep.subr.msk.bf16.mxu0 %vm907_vm14, %v1293_v14  ;;  %vm332_vm14 = vcmp.eq.s32.totalorder %v264_v36, %v1513_v8 }
  0xa0   : > { %vm919_vm0 = vmpackc.low %vm332_vm14, %vm330_vm13  ;;  %vm337_vm13 = vcmp.eq.s32.totalorder %v267_v39, %v1515_v9  ;;  %vm339_vm14 = vcmp.eq.s32.totalorder %v268_v40, %v1515_v9 }
  0xa2   : > { %910 = vmatpush1.bf16.msk.msra.mxu1 %vm909_vm3, %v1293_v14  ;;  %978 = vmatpush1.bf16.msk.msra.mxu0 %vm909_vm3, %v1293_v14  ;;  %vm334_vm3 = vcmp.eq.s32.totalorder %v265_v37, %v1513_v8 }
  0xa3   : > { %912 = vmatprep.subr.msk.bf16.mxu1 %vm911_vm4, %v1293_v14  ;;  %980 = vmatprep.subr.msk.bf16.mxu0 %vm911_vm4, %v1293_v14  ;;  %vm336_vm4 = vcmp.eq.s32.totalorder %v266_v38, %v1513_v8 }
  0xa4   : > { %vm923_vm6 = vmpackc.low %vm336_vm4, %vm334_vm3 }
  0xa6   : > { %914 = vmatpush1.bf16.msk.msra.mxu1 %vm913_vm9, %v1293_v14  ;;  %982 = vmatpush1.bf16.msk.msra.mxu0 %vm913_vm9, %v1293_v14  ;;  %vm338_vm9 = vcmp.eq.s32.totalorder %v267_v39, %v1513_v8 }
  0xa7   : > { %916 = vmatprep.subr.msk.bf16.mxu1 %vm915_vm10, %v1293_v14  ;;  %984 = vmatprep.subr.msk.bf16.mxu0 %vm915_vm10, %v1293_v14  ;;  %vm340_vm10 = vcmp.eq.s32.totalorder %v268_v40, %v1513_v8 }
  0xa8   : > { %vm927_vm12 = vmpackc.low %vm340_vm10, %vm338_vm9 }
  0xaa   : > { %918 = vmatpush1.bf16.msk.msra.mxu1 %vm917_vm15, %v1293_v14  ;;  %986 = vmatpush1.bf16.msk.msra.mxu0 %vm917_vm15, %v1293_v14  ;;  %vm929_vm15 = vmpackc.low %vm339_vm14, %vm337_vm13 }
  0xab   : > { %920 = vmatprep.subr.msk.bf16.mxu1 %vm919_vm0, %v1293_v14  ;;  %988 = vmatprep.subr.msk.bf16.mxu0 %vm919_vm0, %v1293_v14 }
  0xae   : > { %922 = vmatpush1.bf16.msk.msra.mxu1 %vm921_vm5, %v1293_v14  ;;  %990 = vmatpush1.bf16.msk.msra.mxu0 %vm921_vm5, %v1293_v14 }
  0xaf   : > { %924 = vmatprep.subr.msk.bf16.mxu1 %vm923_vm6, %v1293_v14  ;;  %992 = vmatprep.subr.msk.bf16.mxu0 %vm923_vm6, %v1293_v14 }
  0xb2   : > { %926 = vmatpush1.bf16.msk.msra.mxu1 %vm925_vm11, %v1293_v14  ;;  %994 = vmatpush1.bf16.msk.msra.mxu0 %vm925_vm11, %v1293_v14 }
  0xb3   : > { %928 = vmatprep.subr.msk.bf16.mxu1 %vm927_vm12, %v1293_v14  ;;  %996 = vmatprep.subr.msk.bf16.mxu0 %vm927_vm12, %v1293_v14 }
  0xb6   : > { %930 = vmatpush1.bf16.msk.msra.mxu1 %vm929_vm15, %v1293_v14  ;;  %998 = vmatpush1.bf16.msk.msra.mxu0 %vm929_vm15, %v1293_v14 }
  0xb9   : > { %562 = vmatmul.mubr.bf16.vlgmr.msra.gmra.mrb[0].mxu1 %v1102_v41  ;;  %635 = vmatmul.mubr.bf16.vlgmr.msra.gmra.mrb[0].mxu0 %v1105_v42 }
  0xba   : > { %571 = vmatprep.mubr.bf16.mxu1 %v1108_v43  ;;  %644 = vmatprep.mubr.bf16.mxu0 %v1110_v44 }
  0xc1   : > { %572 = vmatmul.mubr.bf16.gmra.mrb[4].mxu1 %v1112_v45  ;;  %645 = vmatmul.mubr.bf16.gmra.mrb[4].mxu0 %v1113_v46 }
 0x18c   : > { %v563_v47 = vpop.f32.mrb[0].mxu1  ;;  %v636_v48 = vpop.f32.mrb[0].mxu0 }
 0x18d   : > { %v637_v49 = vadd.f32 %v636_v48, %v563_v47  ;;  %v565_v50 = vpop.f32.mrb[1].mxu1  ;;  %v638_v51 = vpop.f32.mrb[1].mxu0 }
 0x18e   : > { %v639_v52 = vadd.f32 %v638_v51, %v565_v50  ;;  %v567_v53 = vpop.f32.mrb[2].mxu1  ;;  %v640_v54 = vpop.f32.mrb[2].mxu0 }
 0x18f   : > { %655 = vst [vmem:[%s233_s22] sm:$0xff] %v637_v49  ;;  %v641_v55 = vadd.f32 %v640_v54, %v567_v53  ;;  %v569_v56 = vpop.f32.mrb[3].mxu1  ;;  %v642_v57 = vpop.f32.mrb[3].mxu0 }
 0x190   : > { %656 = vst [vmem:[%s233_s22 + $0x8] sm:$0xff] %v639_v52  ;;  %v643_v58 = vadd.f32 %v642_v57, %v569_v56 }
 0x191   : > { %657 = vst [vmem:[%s233_s22 + $0x10] sm:$0xff] %v641_v55 }
 0x192   : > { %658 = vst [vmem:[%s233_s22 + $0x18] sm:$0xff] %v643_v58 }
 0x194   : > { %v573_v59 = vpop.f32.mrb[4].mxu1  ;;  %v646_v60 = vpop.f32.mrb[4].mxu0 }
 0x195   : > { %v647_v61 = vadd.f32 %v646_v60, %v573_v59  ;;  %v575_v62 = vpop.f32.mrb[5].mxu1  ;;  %v648_v63 = vpop.f32.mrb[5].mxu0 }
 0x196   : > { %v649_v0 = vadd.f32 %v648_v63, %v575_v62  ;;  %v577_v1 = vpop.f32.mrb[6].mxu1  ;;  %v650_v2 = vpop.f32.mrb[6].mxu0 }
 0x197   : > { %659 = vst [vmem:[%s233_s22 + $0x20] sm:$0xff] %v647_v61  ;;  %v651_v3 = vadd.f32 %v650_v2, %v577_v1  ;;  %v579_v4 = vpop.f32.mrb[7].mxu1  ;;  %v652_v5 = vpop.f32.mrb[7].mxu0 }
 0x198   : > { %660 = vst [vmem:[%s233_s22 + $0x28] sm:$0xff] %v649_v0  ;;  %v653_v6 = vadd.f32 %v652_v5, %v579_v4 }
 0x199   : > { %661 = vst [vmem:[%s233_s22 + $0x30] sm:$0xff] %v651_v3 }
 0x19a   : > { %662 = vst [vmem:[%s233_s22 + $0x38] sm:$0xff] %v653_v6 }
 0x19b   : > { %1213 = shalt.err (!%p1210_p5)
}
 0x19c   : > { %s1214_s5 = scalar_lea.hbm %s1690_s15, 1024  ;;  %s1218_s25 = scalar_lea.hbm %s1741_s3, 8192 }
 0x19d   : > { %p1215_p9 = scmp.ne.s32.totalorder %s1690_s15, %s1214_s5  ;;  %p1219_p7 = scmp.lt.u32.totalorder %s1690_s15, %s1741_s3 }
 0x19e   : > { %p1220_p3 = scmp.lt.u32.totalorder %s1218_s25, %s1214_s5  ;;  %p1222_p10 = scmp.lt.u32.totalorder %s1214_s5, %s1690_s15 }
 0x19f   : > { %p1216_p12 = pnand %p1215_p9, %p1442_p8 }
 0x1a0   : > { %p1221_p1 = por %p1220_p3, %p1219_p7 }
 0x1a1   : > { %p1217_p11 = pneg %p1216_p12 }
 0x1a2   : > { %p1223_p2 = por %p1222_p10, %p1221_p1 }
 0x1a4   : > { %p1224_p4 = pnand %p1223_p2, %p1217_p11 }
 0x1a6   : > { %1227 = shalt.err (!%p1224_p4)
}
 0x1a7   : > { %s1295_s22 = smov 256   ;;  %s1296_s6 = smov 16  }
 0x1a8   : > { %1024 = dma.vmem_to_hbm [thread:$0]  (%p1442_p8), %s1685_s24, 1024, %s1690_s15, %s664_s26, %s1295_s22, %s1295_s22, %s1296_s6  }
 0x1a9 PF: > { %p1046_p6 = scmp.ge.s32.totalorder %s1286_s17, 2  ;;  %s694_s7 = sand.u32 1, %s1266_s12  }
 0x1aa   : > { %p1758_p13 = scmp.ne.s32.totalorder %s1749_s23, 0  ;;  %s695_s8 = scalar_lea.sflag [#allocation4], %s694_s7 }
 0x1ac   : > { %p1038_p0 = pnand %p1046_p6, %p1758_p13 }
 0x1ae   : > { %1261 = dma.done.wait (!%p1038_p0), %s695_s8, 1024  }
 0x1af   : > { %1263 = vsyncadd (!%p1038_p0), %s695_s8, 4294966272  ;;  %s20_s17 = sadd.s32 1, %s1286_s17   ;;  %s1759_s12 = smov %s1270_s13 }
 0x1b0   : > { %p17_p5 = scmp.ge.s32.totalorder %s20_s17, 10   ;;  %s1760_s13 = smov %s1274_s14 }
 0x1b1   : > { %s1761_s14 = smov %s1451_s18  ;;  %s1762_s15 = smov %s1282_s16 }
 0x1b2   : > { %s1763_s16 = smov %s1765_s19  ;;  %19 = sbr.rel (!%p17_p5) target bundleno = 7 (0x7), region = 85 }
 0x1b9   :  { %700 = vsyncpa [#allocation3], 1 }
 0x1ba   :  { %702 = vsyncpa [#allocation3 + $0x1], 1 }
 0x1bb   :  { %703 = vsyncpa [#allocation6], 1 }
 0x1bc   :  { %704 = vsyncpa [#allocation4], 1 }
 0x1bd   :  { %706 = vsyncpa [#allocation4 + $0x1], 1 }

</bundles_post_ra>
